<compile_context>
chip_gen: v6e
topology: v6e:2x2x1
jax: 0.10.0
libtpu: 0.0.40
codegen_flags: <defaults>
</compile_context>

<pallas_src>
import functools

import jax
import jax.numpy as jnp
from jax import lax
from jax.experimental import pallas as pl
from jax.experimental.pallas import tpu as pltpu


_MODE_DIM_FLIP = {
    "bottom": (2, False),
    "left": (3, True),
    "right": (3, False),
    "top": (2, True),
}

_TARGET_TILE_BYTES = 4 << 20      # ~4 MiB HBM tiles (2-4 MiB sweet spot)
_SLAB_BYTES = 32 << 10            # per-inner-iteration slab (register friendly)
_MIN_GRID_STEPS = 4               # >= 2 grid steps per v7x TensorCore
_VMEM_LIMIT = 32 * 1024 * 1024    # in+out double-buffered 4 MiB tiles = 16 MiB


def _cdiv(a, b):
    return (a + b - 1) // b


def _round_up(a, b):
    return _cdiv(a, b) * b


def _round_down(a, b):
    return (a // b) * b


def _sublane_unit(itemsize):
    # Sublane packing: 32-bit -> 8, 16-bit -> 16, 8-bit -> 32 rows per vreg.
    return 8 * max(1, 4 // itemsize)


# ---------------------------------------------------------------------------
# In-kernel directional cumulative max (Hillis-Steele scan) on 2-D slabs.
# ---------------------------------------------------------------------------

def _scan_plan(length, align_unit, roll_ok):
    """Static plan: list of (shift d, use_roll) scan steps."""
    plan = []
    d = 1
    while d < length:
        plan.append((d, roll_ok and (d % align_unit != 0)))
        d *= 2
    return plan


def _build_masks(length, axis, reverse, plan):
    """Precompute the small 1-D validity masks used by the roll steps."""
    ds = [d for d, use_roll in plan if use_roll]
    if not ds:
        return {}
    shape = [1, 1]
    shape[axis] = length
    idx = lax.broadcasted_iota(jnp.int32, tuple(shape), axis)
    if reverse:
        return {d: idx < (length - d) for d in ds}
    return {d: idx >= d for d in ds}


def _apply_scan(x, axis, reverse, plan, masks):
    """Directional inclusive max-scan over `axis` of a 2-D slab value `x`."""
    length = x.shape[axis]
    for d, use_roll in plan:
        if use_roll:
            shift = d if not reverse else (length - d)
            rolled = pltpu.roll(x, shift=shift, axis=axis)
            # masks[d] is (1, W) or (H, 1); broadcast inside the select.
            x = jnp.where(masks[d], jnp.maximum(x, rolled), x)
        else:
            # Edge-replicated shift: wrapped positions see x itself; max is
            # idempotent, so no identity value or mask is needed (int-safe).
            if not reverse:
                shifted = jnp.concatenate(
                    [lax.slice_in_dim(x, 0, d, axis=axis),
                     lax.slice_in_dim(x, 0, length - d, axis=axis)],
                    axis=axis)
            else:
                shifted = jnp.concatenate(
                    [lax.slice_in_dim(x, d, length, axis=axis),
                     lax.slice_in_dim(x, length - d, length, axis=axis)],
                    axis=axis)
            x = jnp.maximum(x, shifted)
    return x


# ---------------------------------------------------------------------------
# Kernels
# ---------------------------------------------------------------------------

def _lane_scan_kernel(x_ref, o_ref, *, reverse, chunk_rows, n_chunks, roll_ok):
    """Cummax over lanes (last axis) of a (rows_block, W) tile."""
    w = x_ref.shape[-1]
    plan = _scan_plan(w, 128, roll_ok)
    masks = _build_masks(w, 1, reverse, plan)   # hoisted out of the row loop

    def body(i, carry):
        r0 = pl.multiple_of(i * chunk_rows, chunk_rows)
        slab = x_ref[pl.ds(r0, chunk_rows), :]
        o_ref[pl.ds(r0, chunk_rows), :] = _apply_scan(slab, 1, reverse, plan, masks)
        return carry

    lax.fori_loop(0, n_chunks, body, 0)


def _sublane_scan_kernel(x_ref, o_ref, *, reverse, roll_ok, sub_unit):
    """Cummax over sublanes (axis 1) of a (Cb, H, Wb) tile, one plane at a time."""
    cb, h, _ = x_ref.shape
    plan = _scan_plan(h, sub_unit, roll_ok)
    masks = _build_masks(h, 0, reverse, plan)   # hoisted out of the channel loop

    def body(i, carry):
        o_ref[i] = _apply_scan(x_ref[i], 0, reverse, plan, masks)
        return carry

    lax.fori_loop(0, cb, body, 0)


# ---------------------------------------------------------------------------
# Wrappers / tiling selection
# ---------------------------------------------------------------------------

def _pool_lanes(x2, reverse):
    """cummax over the last axis of a 2-D (rows, W) view ('left'/'right')."""
    rows, w = x2.shape
    itemsize = x2.dtype.itemsize
    sub_unit = _sublane_unit(itemsize)
    row_bytes = w * itemsize

    # Rows per in-kernel slab: register-friendly, multiple of the sublane unit.
    chunk_rows = _round_down(max(_SLAB_BYTES // row_bytes, sub_unit), sub_unit)
    chunk_rows = max(sub_unit, min(chunk_rows, _round_up(rows, sub_unit)))
    # Rows per grid block: multiple of chunk_rows, ~4 MiB.
    rb = chunk_rows * max(1, _TARGET_TILE_BYTES // (chunk_rows * row_bytes))
    rb = min(rb, _round_up(rows, chunk_rows))
    # Keep >= _MIN_GRID_STEPS grid steps so both v7x TensorCores can pipeline.
    while _cdiv(rows, rb) < _MIN_GRID_STEPS and rb > chunk_rows:
        rb = max(chunk_rows, _round_down(rb // 2, chunk_rows))

    roll_ok = (w % 128) == 0
    kernel = functools.partial(
        _lane_scan_kernel, reverse=reverse, chunk_rows=chunk_rows,
        n_chunks=rb // chunk_rows, roll_ok=roll_ok)

    return pl.pallas_call(
        kernel,
        out_shape=jax.ShapeDtypeStruct(x2.shape, x2.dtype),
        grid=(_cdiv(rows, rb),),
        in_specs=[pl.BlockSpec((rb, w), lambda i: (i, 0))],
        out_specs=pl.BlockSpec((rb, w), lambda i: (i, 0)),
        compiler_params=pltpu.CompilerParams(
            dimension_semantics=("parallel",),
            vmem_limit_bytes=_VMEM_LIMIT,
        ),
    )(x2)


def _pool_sublanes(x3, reverse):
    """cummax over axis 1 (H) of a 3-D (channels, H, W) view ('bottom'/'top')."""
    nc, h, w = x3.shape
    itemsize = x3.dtype.itemsize
    sub_unit = _sublane_unit(itemsize)

    # Lane block of the non-scan W axis: keeps per-channel slabs small and
    # huge planes inside the scoped-VMEM budget.  Must be a multiple of 128
    # (partial last block is fine) or the full width.
    if w < 128:
        # TODO(synk): fold channels into lanes (lane-dense stores) for W < 128
        # feature levels; needs a wrapper-side transpose, skipped here.
        wb = w
    else:
        wb = max(128, _round_down((64 << 10) // (h * itemsize), 128))
        wb = min(wb, w if w % 128 == 0 else _round_down(w, 128))

    plane_bytes = h * wb * itemsize
    cb = min(nc, max(1, _TARGET_TILE_BYTES // plane_bytes))
    n_w = _cdiv(w, wb)
    # >= _MIN_GRID_STEPS grid steps (v7x: 2 steps per TensorCore).
    while _cdiv(nc, cb) * n_w < _MIN_GRID_STEPS and cb > 1:
        cb = max(1, cb // 2)

    roll_ok = (wb % 128 == 0) and (h % sub_unit == 0)
    kernel = functools.partial(
        _sublane_scan_kernel, reverse=reverse, roll_ok=roll_ok, sub_unit=sub_unit)

    return pl.pallas_call(
        kernel,
        out_shape=jax.ShapeDtypeStruct(x3.shape, x3.dtype),
        grid=(_cdiv(nc, cb), n_w),
        in_specs=[pl.BlockSpec((cb, h, wb), lambda i, j: (i, 0, j))],
        out_specs=pl.BlockSpec((cb, h, wb), lambda i, j: (i, 0, j)),
        compiler_params=pltpu.CompilerParams(
            dimension_semantics=("parallel", "parallel"),
            vmem_limit_bytes=_VMEM_LIMIT,
        ),
    )(x3)


@functools.partial(jax.jit, static_argnames=("mode",))
def corner_pool(x, mode):
    """CornerPool forward.  x: (N, C, H, W)."""
    assert mode in _MODE_DIM_FLIP
    dim, flip = _MODE_DIM_FLIP[mode]
    n, c, h, w = x.shape
    if dim == 3:   # 'left' / 'right': scan over W -> lane scan on a 2-D view
        out = _pool_lanes(x.reshape(n * c * h, w), flip)
    else:          # 'bottom' / 'top': scan over H -> sublane scan on a 3-D view
        out = _pool_sublanes(x.reshape(n * c, h, w), flip)
    return out.reshape(n, c, h, w)


def _corner_pool_ref(x, mode):
    """Pure-JAX reference mirroring the PyTorch forward."""
    dim, flip = _MODE_DIM_FLIP[mode]
    if flip:
        x = jnp.flip(x, axis=dim)
    out = lax.cummax(x, axis=dim)
    if flip:
        out = jnp.flip(out, axis=dim)
    return out


if __name__ == "__main__":
    key = jax.random.PRNGKey(0)
    k1, k2, k3 = jax.random.split(key, 3)
    test_inputs = [
        # small, unaligned planes -> slice+concat fallback path
        jax.random.normal(k1, (2, 4, 16, 16), dtype=jnp.float32),
        # 128x128 planes -> aligned fast path (roll for sub-vreg shifts,
        # slice+concat for vreg-aligned shifts), cdiv channel grid
        jax.random.normal(k2, (1, 8, 128, 128), dtype=jnp.float32),
        # integer dtype (no -inf identity needed anywhere)
        jax.random.randint(k3, (2, 4, 16, 16), -100, 100, dtype=jnp.int32),
    ]

    ok = True
    for x in test_inputs:
        for mode in ("bottom", "left", "right", "top"):
            out = corner_pool(x, mode=mode)
            jax.block_until_ready(out)
            ref = _corner_pool_ref(x, mode)
            if out.shape != ref.shape or out.dtype != ref.dtype:
                ok = False
            if not bool(jnp.array_equal(out, ref)):
                ok = False

    print("KERNEL_OK" if ok else "KERNEL_MISMATCH")
</pallas_src>

<mosaic_0001>
module attributes {stable_mosaic.version = 11 : i64} {
  func.func @_sublane_scan_kernel(%arg0: i32, %arg1: i32, %arg2: memref<2x16x16xf32, #tpu.memory_space<vmem>>, %arg3: memref<2x16x16xf32, #tpu.memory_space<vmem>>) attributes {dimension_semantics = [#tpu.dimension_semantics<parallel>, #tpu.dimension_semantics<parallel>], iteration_bounds = array<i64: 4, 1>, scalar_prefetch = 0 : i64, scratch_operands = 0 : i64, tpu.core_type = #tpu.core_type<tc>, window_params = [{transform_indices = @transform_0, window_bounds = array<i64: 2, 16, 16>}, {transform_indices = @transform_1, window_bounds = array<i64: 2, 16, 16>}]} {
    %c0_i32 = arith.constant 0 : i32
    %c2_i32 = arith.constant 2 : i32
    %0 = arith.addi %c0_i32, %c2_i32 : i32
    %c1_i32 = arith.constant 1 : i32
    scf.for %arg4 = %c0_i32 to %0 step %c1_i32  : i32 {
      %1 = arith.index_cast %arg4 : i32 to index
      %c0 = arith.constant 0 : index
      %c0_1 = arith.constant 0 : index
      %2 = vector.load %arg2[%1, %c0, %c0_1] : memref<2x16x16xf32, #tpu.memory_space<vmem>>, vector<1x16x16xf32>
      %3 = vector.shape_cast %2 : vector<1x16x16xf32> to vector<16x16xf32>
      %4 = vector.extract_strided_slice %3 {offsets = [0, 0], sizes = [1, 16], strides = [1, 1]} : vector<16x16xf32> to vector<1x16xf32>
      %5 = vector.extract_strided_slice %3 {offsets = [0, 0], sizes = [15, 16], strides = [1, 1]} : vector<16x16xf32> to vector<15x16xf32>
      %6 = tpu.concatenate %4, %5 in 0 : vector<1x16xf32>, vector<15x16xf32> -> vector<16x16xf32>
      %7 = arith.maximumf %3, %6 : vector<16x16xf32>
      %8 = vector.extract_strided_slice %7 {offsets = [0, 0], sizes = [2, 16], strides = [1, 1]} : vector<16x16xf32> to vector<2x16xf32>
      %9 = vector.extract_strided_slice %7 {offsets = [0, 0], sizes = [14, 16], strides = [1, 1]} : vector<16x16xf32> to vector<14x16xf32>
      %10 = tpu.concatenate %8, %9 in 0 : vector<2x16xf32>, vector<14x16xf32> -> vector<16x16xf32>
      %11 = arith.maximumf %7, %10 : vector<16x16xf32>
      %12 = vector.extract_strided_slice %11 {offsets = [0, 0], sizes = [4, 16], strides = [1, 1]} : vector<16x16xf32> to vector<4x16xf32>
      %13 = vector.extract_strided_slice %11 {offsets = [0, 0], sizes = [12, 16], strides = [1, 1]} : vector<16x16xf32> to vector<12x16xf32>
      %14 = tpu.concatenate %12, %13 in 0 : vector<4x16xf32>, vector<12x16xf32> -> vector<16x16xf32>
      %15 = arith.maximumf %11, %14 : vector<16x16xf32>
      %16 = vector.extract_strided_slice %15 {offsets = [0, 0], sizes = [8, 16], strides = [1, 1]} : vector<16x16xf32> to vector<8x16xf32>
      %17 = vector.extract_strided_slice %15 {offsets = [0, 0], sizes = [8, 16], strides = [1, 1]} : vector<16x16xf32> to vector<8x16xf32>
      %18 = tpu.concatenate %16, %17 in 0 : vector<8x16xf32>, vector<8x16xf32> -> vector<16x16xf32>
      %19 = arith.maximumf %15, %18 : vector<16x16xf32>
      %20 = arith.index_cast %arg4 : i32 to index
      %c0_2 = arith.constant 0 : index
      %c0_3 = arith.constant 0 : index
      %21 = vector.load %arg3[%20, %c0_2, %c0_3] : memref<2x16x16xf32, #tpu.memory_space<vmem>>, vector<1x16x16xf32>
      %22 = vector.shape_cast %21 : vector<1x16x16xf32> to vector<16x16xf32>
      %23 = vector.shape_cast %19 : vector<16x16xf32> to vector<1x16x16xf32>
      tpu.vector_store %arg3[%20, %c0_2, %c0_3], %23 {strides = array<i32>} : memref<2x16x16xf32, #tpu.memory_space<vmem>>, vector<1x16x16xf32>,
    }
    %c2_i32_0 = arith.constant 2 : i32
    return
  }
  func.func @transform_0(%arg0: i32, %arg1: i32) -> (i32, i32, i32) {
    %c0_i32 = arith.constant 0 : i32
    %c0_i32_0 = arith.constant 0 : i32
    return %arg0, %c0_i32, %arg1 : i32, i32, i32
  }
  func.func @transform_1(%arg0: i32, %arg1: i32) -> (i32, i32, i32) {
    %c0_i32 = arith.constant 0 : i32
    %c0_i32_0 = arith.constant 0 : i32
    return %arg0, %c0_i32, %arg1 : i32, i32, i32
  }
}

</mosaic_0001>

<bundles_post_ra>
// kernel: corner_pool.1
= control target key start
LH: loop header
LB: loop body
LE: loop exit
PB: predicated region body
PF: predicated region fallthrough
CT: control target
= control target key end

     0   :  { %6 = vsyncpa [#allocation3], 0  ;;  %s703_s0 = inlined_call_operand.hbm [shape: f32[8,16,16], index: 0, kind: input, shape index: {}]   ;;  %s704_s1 = inlined_call_operand.hbm [shape: f32[8,16,16], index: 1, kind: output, shape index: {}]  }
   0x1   :  { %8 = vsyncpa [#allocation3 + $0x1], 0 }
   0x2   :  { %9 = vsyncpa [#allocation4], 0 }
   0x3   :  { %11 = vsyncpa [#allocation4 + $0x1], 0  ;;  %s543_s6 = smov 0   ;;  %s545_s7 = smov 0  }
   0x4   :  { %s547_s8 = smov 0   ;;  %s549_s9 = smov 0  }
   0x5   :  { %s551_s10 = smov 0   ;;  %s553_s11 = smov 0  }
   0x6 LB: > { %s313_s12 = sadd.s32 4294967295, %s521_s11   ;;  %s314_s13 = sadd.s32 4294967294, %s521_s11   ;;  %s521_s11 = sphi %s553_s11, %s17_s11   ;;  %s517_s10 = sphi %s551_s10, %s714_s10   ;;  %s513_s9 = sphi %s549_s9, %s713_s9   ;;  %s509_s8 = sphi %s547_s8, %s712_s8   ;;  %s505_s7 = sphi %s545_s7, %s711_s7   ;;  %s501_s6 = sphi %s543_s6, %s710_s6  }
   0x7   : > { %s29_s14 = sadd.s32 1, %s517_s10  ;;  %s38_s15 = sadd.s32 1, %s509_s8 }
   0x8   : > { %p31_p0 = scmp.ge.s32.totalorder %s29_s14, 4  ;;  %p45_p1 = scmp.ne.s32.totalorder %s509_s8, %s505_s7 }
   0x9   : > { %p46_p2 = scmp.eq.s32.totalorder %s521_s11, 0  ;;  %p51_p3 = scmp.ne.s32.totalorder %s505_s7, %s501_s6 }
   0xa   : > { %s716_s14 = smov (%p31_p0, %s29_s14), 0  ;;  %p52_p5 = scmp.eq.s32.totalorder %s313_s12, 0 }
   0xb   : > { %p584_p4 = por %p46_p2, %p45_p1  ;;  %s33_s17 = ssub.s32 %s517_s10, %s716_s14 }
   0xc   : > { %p77_p6 = scmp.eq.s32.totalorder %s313_s12, 3  ;;  %p36_p7 = scmp.eq.s32.totalorder %s33_s17, 0 }
   0xd   : > { %p590_p8 = por %p52_p5, %p51_p3  ;;  %p83_p10 = scmp.eq.s32.totalorder %s314_s13, 3 }
   0xe   : > { %p594_p9 = por %p77_p6, %p45_p1  ;;  %p347_p12 = scmp.lt.s32.totalorder %s521_s11, 4 }
   0xf   : > { %s599_s20 = scalar_select %p36_p7, %s509_s8, %s38_s15  }
  0x10   : > { %p601_p11 = por %p83_p10, %p51_p3  ;;  %s103_s22 = sand.u32 1, %s509_s8  }
  0x11   : > { %s317_s23 = sshll.u32 %s103_s22, 5  ;;  %s332_s24 = sshll.u32 %s517_s10, 9 }
  0x12   : > { %s115_s27 = scalar_lea.hbm %s703_s0, %s332_s24  ;;  %s107_s28 = scalar_lea.vmem [#allocation2], %s317_s23 }
  0x13   : > { %s116_s29 = sshll.u32 %s107_s28, 4  ;;  %p613_p13 = pnand %p347_p12, %p584_p4  ;;  %s117_s29 = int_to_ptr.vmem [resolvable:$true] %s116_s29 }
  0x14   : > { %p321_p0 = scmp.ge.s32.totalorder %s521_s11, 1  ;;  %s104_s2 = scalar_lea.sflag [#allocation3], %s103_s22 }
  0x15   : > { %p411_p1 = pneg %p613_p13  ;;  %s422_s3 = scalar_lea.vmem %s117_s29, 512 }
  0x16   : > { %p423_p2 = scmp.ne.s32.totalorder %s117_s29, %s422_s3  ;;  %s527_s4 = smov [#allocation2]  }
  0x17   : > { %s427_s5 = sshll.u32 %s527_s4, 4  ;;  %s428_s5 = int_to_ptr.vmem [resolvable:$false] %s427_s5 }
  0x18   : > { %p425_p3 = pnand %p423_p2, %p411_p1  ;;  %s429_s12 = scalar_lea.vmem %s428_s5, 1024 }
  0x19   : > { %p430_p6 = scmp.lt.s32.totalorder %s117_s29, %s428_s5  ;;  %p431_p7 = scmp.lt.s32.totalorder %s429_s12, %s422_s3 }
  0x1a   : > { %p426_p5 = pneg %p425_p3 }
  0x1b   : > { %p432_p10 = por %p431_p7, %p430_p6 }
  0x1d   : > { %p433_p4 = pnand %p432_p10, %p426_p5 }
  0x1f   : > { %436 = shalt.err (!%p433_p4)
}
  0x20   : > { %s528_s13 = smov 128   ;;  %s529_s15 = smov 8  }
  0x21   : > { %342 = dma.hbm_to_vmem [thread:$0]  (!%p613_p13), %s115_s27, 512, %s117_s29, %s104_s2, %s528_s13, %s528_s13, %s529_s15  }
  0x22   : > { %p124_p12 = scmp.lt.s32.totalorder %s521_s11, 5 }
  0x24   : > { %p125_p1 = pnand %p321_p0, %p124_p12 }
  0x25   : > { %s626_s16 = sand.u32 (!%p125_p1), 1, %s505_s7  }
  0x26   : > { %128 = sbr.rel (%p125_p1) target bundleno = 79 (0x4f), region = 24  ;;  %s322_s17 = sshll.u32 (!%p125_p1), %s626_s16, 5 }
  0x27   : > { %s131_s22 = scalar_lea.sflag (!%p125_p1), [#allocation3], %s626_s16  ;;  %s630_s23 = scalar_lea.vmem (!%p125_p1), [#allocation2], %s322_s17 }
  0x2b   : > { %492 = dma.done.wait (%p590_p8), %s131_s22, 512  }
  0x2c   : > { %494 = vsyncadd (%p590_p8), %s131_s22, 4294966784  ;;  %s636_s24 = scalar_lea.vmem [#allocation5], %s322_s17  ;;  %s638_s25 = smov 0  }
  0x2d LB: >> { %s324_s26 = sshll.u32 %s525_s25, 4  ;;  %vm167_vm0 = vcmask 1040384   ;;  %vm178_vm1 = vcmask 1041408   ;;  %vm189_vm2 = vcmask 1043456   ;;  %vm200_vm3 = vcmask 130048   ;;  %s160_s25 = sadd.s32 1, %s525_s25   ;;  %s525_s25 = sphi %s638_s25, %s160_s25  }
  0x2e   : >> { %s162_s27 = scalar_lea.vmem %s630_s23, %s324_s26 [#allocation2]  ;;  %s199_s18 = scalar_lea.vmem %s636_s24, %s324_s26 [#allocation5] }
  0x2f   : >> { %v163_v0 = vld [vmem:[%s162_s27] sm:$0xff]  ;;  %v164_v1 = vld [vmem:[%s162_s27 + $0x8] sm:$0xff]  ;;  %p157_p8 = scmp.ge.s32.totalorder %s160_s25, 2  }
  0x30   : >> { %v168_v2 = vrot.slane %v163_v0, 7  ;;  %v169_v3 = vrot.slane %v164_v1, 7  ;;  %s334_s28 = sshll.u32 (%p157_p8), %s513_s9, 9  ;;  %s219_s3 = sshll.u32 (%p157_p8), %s636_s24, 4  ;;  %s656_s3 = int_to_ptr.vmem [resolvable:$true] %s219_s3 }
  0x31   : > { %s653_s2 = scalar_lea.hbm (%p157_p8), %s704_s1, %s334_s28  ;;  %s204_s4 = scalar_lea.sflag (%p157_p8), [#allocation4], %s626_s16 }
  0x32   : >> { %v170_v4 = vsel %vm167_vm0, %v168_v2, %v169_v3  ;;  %v173_v5 = vsel %vm167_vm0, %v163_v0, %v168_v2  ;;  %s437_s5 = scalar_lea.vmem (%p157_p8), %s656_s3, 512  ;;  %s530_s12 = smov (%p157_p8), [#allocation5]  }
  0x33   : >> { %v174_v6 = vmax.f32 %v163_v0, %v173_v5  ;;  %v175_v7 = vmax.f32 %v164_v1, %v170_v4  ;;  %p438_p13 = scmp.ne.s32.totalorder (%p157_p8), %s656_s3, %s437_s5  ;;  %s441_s13 = sshll.u32 (%p157_p8), %s530_s12, 4  ;;  %s442_s13 = int_to_ptr.vmem [resolvable:$false] %s441_s13 }
  0x34   : > { %s443_s9 = scalar_lea.vmem (%p157_p8), %s442_s13, 1024  ;;  %p444_p3 = scmp.lt.s32.totalorder (%p157_p8), %s656_s3, %s442_s13 }
  0x35   : >> { %v179_v8 = vrot.slane %v174_v6, 6  ;;  %v180_v9 = vrot.slane %v175_v7, 6  ;;  %p439_p0 = pnand (%p157_p8), %p438_p13, %p594_p9  ;;  %p445_p5 = scmp.lt.s32.totalorder (%p157_p8), %s443_s9, %s437_s5 }
  0x37   : >> { %v181_v10 = vsel %vm178_vm1, %v179_v8, %v180_v9  ;;  %v184_v11 = vsel %vm178_vm1, %v174_v6, %v179_v8  ;;  %p440_p2 = pneg (%p157_p8), %p439_p0  ;;  %p446_p6 = por (%p157_p8), %p445_p5, %p444_p3 }
  0x38   : >> { %v185_v12 = vmax.f32 %v174_v6, %v184_v11  ;;  %v186_v13 = vmax.f32 %v175_v7, %v181_v10 }
  0x39   : > { %p447_p7 = pnand (%p157_p8), %p446_p6, %p440_p2 }
  0x3a   : >> { %v190_v14 = vrot.slane %v185_v12, 4  ;;  %v191_v15 = vrot.slane %v186_v13, 4 }
  0x3c   : >> { %v195_v16 = vsel %vm189_vm2, %v185_v12, %v190_v14  ;;  %v192_v17 = vsel %vm189_vm2, %v190_v14, %v191_v15 }
  0x3d   : >> { %v196_v18 = vmax.f32 %v185_v12, %v195_v16  ;;  %v197_v19 = vmax.f32 %v186_v13, %v192_v17  ;;  %159 = sbr.rel (!%p157_p8) target bundleno = 45 (0x2d), region = 78 }
  0x3f   : >> { %201 = vst.msk [vmem:[%s199_s18] sm:$0xff] %vm200_vm3, %v196_v18  ;;  %v198_v20 = vmax.f32 %v197_v19, %v196_v18 }
  0x41   : >> { %202 = vst.msk [vmem:[%s199_s18 + $0x8] sm:$0xff] %vm200_vm3, %v198_v20 }
  0x42   : > { %450 = shalt.err (!%p447_p7)
}
  0x43   : > { %s451_s15 = scalar_lea.hbm %s653_s2, 512  ;;  %s455_s23 = scalar_lea.hbm %s704_s1, 2048 }
  0x44   : > { %p452_p10 = scmp.ne.s32.totalorder %s653_s2, %s451_s15  ;;  %p456_p1 = scmp.lt.s32.totalorder %s653_s2, %s704_s1 }
  0x45   : > { %p457_p8 = scmp.lt.s32.totalorder %s455_s23, %s451_s15 }
  0x46   : > { %p453_p4 = pnand %p452_p10, %p594_p9 }
  0x47   : > { %p458_p13 = por %p457_p8, %p456_p1 }
  0x48   : > { %p454_p12 = pneg %p453_p4 }
  0x4a   : > { %p459_p0 = pnand %p458_p13, %p454_p12 }
  0x4c   : > { %462 = shalt.err (!%p459_p0)
}
  0x4d   : > { %s531_s26 = smov 128   ;;  %s532_s27 = smov 8  }
  0x4e   : > { %337 = dma.vmem_to_hbm [thread:$0]  (%p594_p9), %s656_s3, 512, %s653_s2, %s204_s4, %s531_s26, %s531_s26, %s532_s27  }
  0x4f PF: > { %p348_p2 = scmp.ge.s32.totalorder %s521_s11, 2  ;;  %s234_s18 = sand.u32 1, %s501_s6  }
  0x50   : > { %s235_s28 = scalar_lea.sflag [#allocation4], %s234_s18 }
  0x51   : > { %p344_p3 = pnand %p348_p2, %p601_p11 }
  0x53   : > { %p345_p5 = pneg %p344_p3 }
  0x55   : > { %496 = dma.done.wait (%p345_p5), %s235_s28, 512  }
  0x56   : > { %498 = vsyncadd (%p345_p5), %s235_s28, 4294966784  ;;  %s17_s11 = sadd.s32 1, %s521_s11   ;;  %s710_s6 = smov %s505_s7 }
  0x57   : > { %p14_p6 = scmp.ge.s32.totalorder %s17_s11, 6   ;;  %s711_s7 = smov %s509_s8 }
  0x58   : > { %s712_s8 = smov %s599_s20  ;;  %s713_s9 = smov %s517_s10 }
  0x59   : > { %s714_s10 = smov %s716_s14  ;;  %16 = sbr.rel (!%p14_p6) target bundleno = 6 (0x6), region = 89 }
  0x5e   :  { %240 = vsyncpa [#allocation3], 1 }
  0x5f   :  { %242 = vsyncpa [#allocation3 + $0x1], 1 }
  0x60   :  { %243 = vsyncpa [#allocation4], 1 }
  0x61   :  { %245 = vsyncpa [#allocation4 + $0x1], 1 }

</bundles_post_ra>
